<compile_context>
chip_gen: v7x
topology: tpu7x:2x2x1
jax: 0.10.0
libtpu: 0.0.40
codegen_flags: <defaults>
</compile_context>

<pallas_src>
import functools
import math

import jax
import jax.numpy as jnp
from jax.experimental import pallas as pl
from jax.experimental.pallas import tpu as pltpu


def _lora_linear_kernel(x_ref, wt_ref, a_ref, bt_ref, bias_ref, out_ref,
                        acc_ref, xa_ref):
    # x_ref:    [TM, TK]      (tile of flattened [M, D] input)
    # wt_ref:   [TK, TN]      (tile of W^T, i.e. [D_in, D_out])
    # a_ref:    [TK, Rp]      (tile of scaling * A)
    # bt_ref:   [Rp, TN]      (tile of B^T)
    # bias_ref: [1, TN]       (f32)
    # out_ref:  [TM, TN]
    # acc_ref:  [TM, TN] f32  (base-path accumulator, carried over K)
    # xa_ref:   [TM, Rp] f32  (x @ A accumulator, carried over K, reused over N)
    j = pl.program_id(1)
    k = pl.program_id(2)
    nk = pl.num_programs(2)

    @pl.when(k == 0)
    def _init_acc():
        # Fold the bias add into the accumulator init (sublane broadcast).
        acc_ref[...] = jnp.broadcast_to(bias_ref[...], acc_ref.shape)

    x = x_ref[...]

    # Base path on the MXU: acc += x_tile @ W^T_tile (f32 accumulation).
    acc_ref[...] += jnp.dot(x, wt_ref[...], preferred_element_type=jnp.float32)

    # LoRA stage 1: xa += x_tile @ (scaling * A)_tile.  x/A tiles do not depend
    # on the N index, so only compute on the first N-block and reuse afterwards.
    @pl.when(jnp.logical_and(j == 0, k == 0))
    def _init_xa():
        xa_ref[...] = jnp.zeros_like(xa_ref)

    @pl.when(j == 0)
    def _acc_xa():
        xa_ref[...] += jnp.dot(x, a_ref[...], preferred_element_type=jnp.float32)

    # Finalize: rank-r matmul + single lane-dense store of the output tile.
    @pl.when(k == nk - 1)
    def _finalize():
        lora = jnp.dot(xa_ref[...].astype(bt_ref.dtype), bt_ref[...],
                       preferred_element_type=jnp.float32)
        out_ref[...] = (acc_ref[...] + lora).astype(out_ref.dtype)


def _round_up(a, b):
    return ((a + b - 1) // b) * b


def _pad2d(a, rows, cols):
    pr, pc = rows - a.shape[0], cols - a.shape[1]
    if pr or pc:
        a = jnp.pad(a, ((0, pr), (0, pc)))
    return a


def lora_linear(x, weight, A, B, bias, scaling, *,
                tm=256, tn=256, tk=512, compute_dtype=None):
    """LoRALinear forward: x @ W.T + bias + scaling * (x @ A) @ B.T.

    x: [BATCH, SEQ, D]; weight: [D, D] (out x in); A, B: [D, r]; bias: [D].
    compute_dtype: dtype of the MXU operands (e.g. jnp.bfloat16 on v6e/v7x);
    accumulation is always f32.
    """
    BATCH, SEQ, D = x.shape
    r = A.shape[1]
    M = BATCH * SEQ
    out_dtype = x.dtype
    if compute_dtype is None:
        compute_dtype = x.dtype

    # ---- wrapper-side layout work (free in XLA, keeps the kernel MXU-only) ----
    x2d = x.reshape(M, D)
    wt = weight.T                       # [D_in, D_out] -> no in-kernel transpose
    a_scaled = A * scaling              # fold scaling into the rank-r factor
    bt = B.T                            # [r, D_out]
    bias2d = bias.reshape(1, D).astype(jnp.float32)

    # ---- pad to (8,128)-aligned, tile-divisible shapes ----
    tm = min(tm, _round_up(M, 8))
    tn = min(tn, _round_up(D, 128))
    tk = min(tk, _round_up(D, 128))
    Mp = _round_up(M, tm)
    Dk = _round_up(D, tk)               # contraction (K) extent
    Dn = _round_up(D, tn)               # output (N) extent
    rp = _round_up(r, 128)              # lane-dense rank

    x_p = _pad2d(x2d, Mp, Dk).astype(compute_dtype)
    wt_p = _pad2d(wt, Dk, Dn).astype(compute_dtype)
    a_p = _pad2d(a_scaled, Dk, rp).astype(compute_dtype)
    bt_p = _pad2d(bt, rp, Dn).astype(compute_dtype)
    bias_p = _pad2d(bias2d, 1, Dn)

    grid = (Mp // tm, Dn // tn, Dk // tk)

    itemsize = jnp.dtype(compute_dtype).itemsize
    cost = pl.CostEstimate(
        flops=2 * Mp * Dn * Dk + 2 * Mp * Dk * rp + 2 * Mp * rp * Dn,
        transcendentals=0,
        bytes_accessed=(x_p.size + wt_p.size + a_p.size + bt_p.size) * itemsize
        + bias_p.size * 4 + Mp * Dn * jnp.dtype(out_dtype).itemsize,
    )

    out_p = pl.pallas_call(
        _lora_linear_kernel,
        out_shape=jax.ShapeDtypeStruct((Mp, Dn), out_dtype),
        grid_spec=pltpu.PrefetchScalarGridSpec(
            num_scalar_prefetch=0,
            grid=grid,
            in_specs=[
                pl.BlockSpec((tm, tk), lambda i, j, k: (i, k)),   # x
                pl.BlockSpec((tk, tn), lambda i, j, k: (k, j)),   # W^T
                pl.BlockSpec((tk, rp), lambda i, j, k: (k, 0)),   # scaling * A
                pl.BlockSpec((rp, tn), lambda i, j, k: (0, j)),   # B^T
                pl.BlockSpec((1, tn), lambda i, j, k: (0, j)),    # bias
            ],
            out_specs=pl.BlockSpec((tm, tn), lambda i, j, k: (i, j)),
            scratch_shapes=[
                pltpu.VMEM((tm, tn), jnp.float32),   # base accumulator
                pltpu.VMEM((tm, rp), jnp.float32),   # x @ A accumulator
            ],
        ),
        compiler_params=pltpu.CompilerParams(
            # M axis can be sharded across TensorCores (v7x megacore); N and K
            # stay sequential (accumulator carry + xa reuse across N).
            dimension_semantics=("parallel", "arbitrary", "arbitrary"),
            vmem_limit_bytes=32 * 1024 * 1024,
        ),
        cost_estimate=cost,
    )(x_p, wt_p, a_p, bt_p, bias_p)

    return out_p[:M, :D].reshape(BATCH, SEQ, D)


if __name__ == "__main__":
    # Small shapes, but big enough that the (M, N, K) grid has 2 steps on every
    # axis with the tiles below, so accumulation/finalize/xa-reuse are exercised.
    BATCH, SEQ, D_MODEL, R = 2, 64, 256, 16
    LORA_SCALING = 0.5

    key = jax.random.PRNGKey(0)
    k_x, k_w, k_a, k_b, k_bias = jax.random.split(key, 5)

    x = jax.random.normal(k_x, (BATCH, SEQ, D_MODEL), dtype=jnp.float32)
    weight = jax.random.normal(k_w, (D_MODEL, D_MODEL), dtype=jnp.float32) * 0.1
    bias = jax.random.normal(k_bias, (D_MODEL,), dtype=jnp.float32) * 0.1

    # reset_parameters(): A ~ kaiming_uniform(a=sqrt(5)) -> U(-1/sqrt(r), ...);
    # B = zeros.  Use a small nonzero B so the LoRA path is exercised.
    bound = 1.0 / math.sqrt(R)
    A = jax.random.uniform(k_a, (D_MODEL, R), minval=-bound, maxval=bound,
                           dtype=jnp.float32)
    B = jax.random.normal(k_b, (D_MODEL, R), dtype=jnp.float32) * 0.05

    run = functools.partial(lora_linear, tm=64, tn=128, tk=128)

    out = jax.block_until_ready(run(x, weight, A, B, bias, LORA_SCALING))

    # Pure-JAX reference matching the PyTorch forward exactly.
    AB = jnp.einsum("ir,or->io", A, B)
    ref = (jnp.einsum("bni,oi->bno", x, weight) + bias
           + jnp.einsum("bni,io->bno", x, AB) * LORA_SCALING)

    assert out.shape == (BATCH, SEQ, D_MODEL)
    assert jnp.allclose(out, ref, atol=2e-3, rtol=2e-3), "f32 mismatch vs reference"

    # bf16 MXU fast path (v6e/v7x): f32 accumulation, looser tolerance.
    out_bf16 = jax.block_until_ready(
        run(x, weight, A, B, bias, LORA_SCALING, compute_dtype=jnp.bfloat16))
    assert jnp.allclose(out_bf16, ref, atol=1.5e-1, rtol=1e-1), \
        "bf16 mismatch vs reference"

    print("KERNEL_OK")
</pallas_src>

<mosaic_0001>
module attributes {stable_mosaic.version = 11 : i64} {
  func.func @_lora_linear_kernel(%arg0: i32, %arg1: i32, %arg2: i32, %arg3: memref<64x128xf32, #tpu.memory_space<vmem>>, %arg4: memref<128x128xf32, #tpu.memory_space<vmem>>, %arg5: memref<128x128xf32, #tpu.memory_space<vmem>>, %arg6: memref<128x128xf32, #tpu.memory_space<vmem>>, %arg7: memref<1x128xf32, #tpu.memory_space<vmem>>, %arg8: memref<64x128xf32, #tpu.memory_space<vmem>>, %arg9: memref<64x128xf32, #tpu.memory_space<vmem>>, %arg10: memref<64x128xf32, #tpu.memory_space<vmem>>) attributes {dimension_semantics = [#tpu.dimension_semantics<parallel>, #tpu.dimension_semantics<arbitrary>, #tpu.dimension_semantics<arbitrary>], iteration_bounds = array<i64: 2, 2, 2>, scalar_prefetch = 0 : i64, scratch_operands = 2 : i64, tpu.core_type = #tpu.core_type<tc>, window_params = [{transform_indices = @transform_0, window_bounds = array<i64: 64, 128>}, {transform_indices = @transform_1, window_bounds = array<i64: 128, 128>}, {transform_indices = @transform_2, window_bounds = array<i64: 128, 128>}, {transform_indices = @transform_3, window_bounds = array<i64: 128, 128>}, {transform_indices = @transform_4, window_bounds = array<i64: 1, 128>}, {transform_indices = @transform_5, window_bounds = array<i64: 64, 128>}]} {
    %c0_i32 = arith.constant 0 : i32
    %0 = arith.cmpi eq, %arg2, %c0_i32 : i32
    %1 = arith.extui %0 : i1 to i32
    %c0_i32_0 = arith.constant 0 : i32
    %2 = arith.cmpi ne, %1, %c0_i32_0 : i32
    scf.if %2 {
      %c0_14 = arith.constant 0 : index
      %c0_15 = arith.constant 0 : index
      %20 = vector.load %arg7[%c0_14, %c0_15] : memref<1x128xf32, #tpu.memory_space<vmem>>, vector<1x128xf32>
      %21 = vector.shape_cast %20 : vector<1x128xf32> to vector<1x128xf32>
      %22 = vector.broadcast %21 : vector<1x128xf32> to vector<64x128xf32>
      %c0_16 = arith.constant 0 : index
      %c0_17 = arith.constant 0 : index
      %23 = vector.load %arg9[%c0_16, %c0_17] : memref<64x128xf32, #tpu.memory_space<vmem>>, vector<64x128xf32>
      tpu.vector_store %arg9[%c0_16, %c0_17], %22 {strides = array<i32>} : memref<64x128xf32, #tpu.memory_space<vmem>>, vector<64x128xf32>,
    } else {
    }
    %c0 = arith.constant 0 : index
    %c0_1 = arith.constant 0 : index
    %3 = vector.load %arg3[%c0, %c0_1] : memref<64x128xf32, #tpu.memory_space<vmem>>, vector<64x128xf32>
    %c0_2 = arith.constant 0 : index
    %c0_3 = arith.constant 0 : index
    %4 = vector.load %arg9[%c0_2, %c0_3] : memref<64x128xf32, #tpu.memory_space<vmem>>, vector<64x128xf32>
    %c0_4 = arith.constant 0 : index
    %c0_5 = arith.constant 0 : index
    %5 = vector.load %arg4[%c0_4, %c0_5] : memref<128x128xf32, #tpu.memory_space<vmem>>, vector<128x128xf32>
    %cst = arith.constant dense<0.000000e+00> : vector<64x128xf32>
    %6 = tpu.matmul %3, %5, %cst {dimension_numbers = #tpu.dot_dimension_numbers<[1], [0], [0], [1], [0, 0, 1, 1], [], []>} : vector<64x128xf32>, vector<128x128xf32>, vector<64x128xf32> -> vector<64x128xf32>
    %7 = arith.addf %4, %6 : vector<64x128xf32>
    %c0_6 = arith.constant 0 : index
    %c0_7 = arith.constant 0 : index
    %8 = vector.load %arg9[%c0_6, %c0_7] : memref<64x128xf32, #tpu.memory_space<vmem>>, vector<64x128xf32>
    tpu.vector_store %arg9[%c0_6, %c0_7], %7 {strides = array<i32>} : memref<64x128xf32, #tpu.memory_space<vmem>>, vector<64x128xf32>,
    %c0_i32_8 = arith.constant 0 : i32
    %9 = arith.cmpi eq, %arg1, %c0_i32_8 : i32
    %c0_i32_9 = arith.constant 0 : i32
    %10 = arith.cmpi eq, %arg2, %c0_i32_9 : i32
    %11 = arith.andi %9, %10 : i1
    %12 = arith.extui %11 : i1 to i32
    %c0_i32_10 = arith.constant 0 : i32
    %13 = arith.cmpi ne, %12, %c0_i32_10 : i32
    scf.if %13 {
      %cst_14 = arith.constant 0.000000e+00 : f32
      %20 = vector.broadcast %cst_14 : f32 to vector<64x128xf32>
      %c0_15 = arith.constant 0 : index
      %c0_16 = arith.constant 0 : index
      %21 = vector.load %arg10[%c0_15, %c0_16] : memref<64x128xf32, #tpu.memory_space<vmem>>, vector<64x128xf32>
      tpu.vector_store %arg10[%c0_15, %c0_16], %20 {strides = array<i32>} : memref<64x128xf32, #tpu.memory_space<vmem>>, vector<64x128xf32>,
    } else {
    }
    %c0_i32_11 = arith.constant 0 : i32
    %14 = arith.cmpi eq, %arg1, %c0_i32_11 : i32
    %15 = arith.extui %14 : i1 to i32
    %c0_i32_12 = arith.constant 0 : i32
    %16 = arith.cmpi ne, %15, %c0_i32_12 : i32
    scf.if %16 {
      %c0_14 = arith.constant 0 : index
      %c0_15 = arith.constant 0 : index
      %20 = vector.load %arg10[%c0_14, %c0_15] : memref<64x128xf32, #tpu.memory_space<vmem>>, vector<64x128xf32>
      %c0_16 = arith.constant 0 : index
      %c0_17 = arith.constant 0 : index
      %21 = vector.load %arg5[%c0_16, %c0_17] : memref<128x128xf32, #tpu.memory_space<vmem>>, vector<128x128xf32>
      %cst_18 = arith.constant dense<0.000000e+00> : vector<64x128xf32>
      %22 = tpu.matmul %3, %21, %cst_18 {dimension_numbers = #tpu.dot_dimension_numbers<[1], [0], [0], [1], [0, 0, 1, 1], [], []>} : vector<64x128xf32>, vector<128x128xf32>, vector<64x128xf32> -> vector<64x128xf32>
      %23 = arith.addf %20, %22 : vector<64x128xf32>
      %c0_19 = arith.constant 0 : index
      %c0_20 = arith.constant 0 : index
      %24 = vector.load %arg10[%c0_19, %c0_20] : memref<64x128xf32, #tpu.memory_space<vmem>>, vector<64x128xf32>
      tpu.vector_store %arg10[%c0_19, %c0_20], %23 {strides = array<i32>} : memref<64x128xf32, #tpu.memory_space<vmem>>, vector<64x128xf32>,
    } else {
    }
    %c1_i32 = arith.constant 1 : i32
    %17 = arith.cmpi eq, %arg2, %c1_i32 : i32
    %18 = arith.extui %17 : i1 to i32
    %c0_i32_13 = arith.constant 0 : i32
    %19 = arith.cmpi ne, %18, %c0_i32_13 : i32
    scf.if %19 {
      %c0_14 = arith.constant 0 : index
      %c0_15 = arith.constant 0 : index
      %20 = vector.load %arg10[%c0_14, %c0_15] : memref<64x128xf32, #tpu.memory_space<vmem>>, vector<64x128xf32>
      %c0_16 = arith.constant 0 : index
      %c0_17 = arith.constant 0 : index
      %21 = vector.load %arg6[%c0_16, %c0_17] : memref<128x128xf32, #tpu.memory_space<vmem>>, vector<128x128xf32>
      %cst_18 = arith.constant dense<0.000000e+00> : vector<64x128xf32>
      %22 = tpu.matmul %20, %21, %cst_18 {dimension_numbers = #tpu.dot_dimension_numbers<[1], [0], [0], [1], [0, 0, 1, 1], [], []>} : vector<64x128xf32>, vector<128x128xf32>, vector<64x128xf32> -> vector<64x128xf32>
      %c0_19 = arith.constant 0 : index
      %c0_20 = arith.constant 0 : index
      %23 = vector.load %arg9[%c0_19, %c0_20] : memref<64x128xf32, #tpu.memory_space<vmem>>, vector<64x128xf32>
      %24 = arith.addf %23, %22 : vector<64x128xf32>
      %c0_21 = arith.constant 0 : index
      %c0_22 = arith.constant 0 : index
      %25 = vector.load %arg8[%c0_21, %c0_22] : memref<64x128xf32, #tpu.memory_space<vmem>>, vector<64x128xf32>
      tpu.vector_store %arg8[%c0_21, %c0_22], %24 {strides = array<i32>} : memref<64x128xf32, #tpu.memory_space<vmem>>, vector<64x128xf32>,
    } else {
    }
    return
  }
  func.func @transform_0(%arg0: i32, %arg1: i32, %arg2: i32) -> (i32, i32) {
    %c0_i32 = arith.constant 0 : i32
    return %arg0, %arg2 : i32, i32
  }
  func.func @transform_1(%arg0: i32, %arg1: i32, %arg2: i32) -> (i32, i32) {
    %c0_i32 = arith.constant 0 : i32
    return %arg2, %arg1 : i32, i32
  }
  func.func @transform_2(%arg0: i32, %arg1: i32, %arg2: i32) -> (i32, i32) {
    %c0_i32 = arith.constant 0 : i32
    %c0_i32_0 = arith.constant 0 : i32
    return %arg2, %c0_i32 : i32, i32
  }
  func.func @transform_3(%arg0: i32, %arg1: i32, %arg2: i32) -> (i32, i32) {
    %c0_i32 = arith.constant 0 : i32
    %c0_i32_0 = arith.constant 0 : i32
    return %c0_i32, %arg1 : i32, i32
  }
  func.func @transform_4(%arg0: i32, %arg1: i32, %arg2: i32) -> (i32, i32) {
    %c0_i32 = arith.constant 0 : i32
    %c0_i32_0 = arith.constant 0 : i32
    return %c0_i32, %arg1 : i32, i32
  }
  func.func @transform_5(%arg0: i32, %arg1: i32, %arg2: i32) -> (i32, i32) {
    %c0_i32 = arith.constant 0 : i32
    return %arg0, %arg1 : i32, i32
  }
}

</mosaic_0001>

<bundles_post_ra>
// kernel: tpu_custom_call.1
= control target key start
LH: loop header
LB: loop body
LE: loop exit
PB: predicated region body
PF: predicated region fallthrough
CT: control target
= control target key end

     0   :  { %s2767_s0 = inlined_call_operand.hbm [shape: f32[128,256], index: 0, kind: input, shape index: {}]   ;;  %s2768_s1 = inlined_call_operand.hbm [shape: f32[256,256], index: 1, kind: input, shape index: {}]   ;;  %s2769_s2 = inlined_call_operand.hbm [shape: f32[256,128], index: 2, kind: input, shape index: {}]   ;;  %s2770_s3 = inlined_call_operand.hbm [shape: f32[128,256], index: 3, kind: input, shape index: {}]   ;;  %s2771_s4 = inlined_call_operand.vmem [shape: f32[1,256], index: 4, kind: input, shape index: {}]   ;;  %s2772_s5 = inlined_call_operand.hbm [shape: f32[128,256], index: 5, kind: output, shape index: {}]  }
   0x1   :  { %2813 = sst [smem:[#allocation41_spill]] %s2767_s0 }
   0x2   :  { %2814 = sst [smem:[#allocation42_spill]] %s2768_s1 }
   0x3   :  { %2815 = sst [smem:[#allocation43_spill]] %s2769_s2 }
   0x4   :  { %2816 = sst [smem:[#allocation44_spill]] %s2770_s3 }
   0x5   :  { %2817 = sst [smem:[#allocation45_spill]] %s2771_s4 }
   0x6   :  { %2818 = sst [smem:[#allocation46_spill]] %s2772_s5 }
   0x7   :  { %10 = vsyncpa [#allocation5], 0 }
   0x8   :  { %12 = vsyncpa [#allocation5 + $0x1], 0 }
   0x9   :  { %13 = vsyncpa [#allocation8], 0 }
   0xa   :  { %15 = vsyncpa [#allocation8 + $0x1], 0 }
   0xb   :  { %16 = vsyncpa [#allocation11], 0 }
   0xc   :  { %18 = vsyncpa [#allocation11 + $0x1], 0 }
   0xd   :  { %19 = vsyncpa [#allocation6], 0 }
   0xe   :  { %21 = vsyncpa [#allocation6 + $0x1], 0  ;;  %s2066_s18 = smov 0   ;;  %s2068_s19 = smov 0  }
   0xf   :  { %s2070_s20 = smov 0   ;;  %s2072_s21 = smov 0  }
  0x10   :  { %s2074_s22 = smov 0   ;;  %s2076_s23 = smov 0  }
  0x11   :  { %s2078_s24 = smov 0   ;;  %s2080_s25 = smov 0  }
  0x12   :  { %s2082_s26 = smov 0   ;;  %s2084_s27 = smov 0  }
  0x13   :  { %s2086_s28 = smov 0   ;;  %s2088_s29 = smov 0  }
  0x14   :  { %s2090_s30 = smov 0   ;;  %s2092_s6 = smov 0  }
  0x15   :  { %s2094_s7 = smov 0   ;;  %s2096_s8 = smov 0  }
  0x16   :  { %s2098_s9 = smov 0   ;;  %s2100_s10 = smov 0  }
  0x17   :  { %s2102_s11 = smov 0   ;;  %s2104_s12 = smov 0  }
  0x18   :  { %s2106_s13 = smov 0   ;;  %s2108_s14 = smov 0  }
  0x19 LB: > { %2819 = sst [smem:[#allocation18_spill]] %s1938_s18  ;;  %s2175_s15 = sadd.s32 4294967295, %s2022_s14   ;;  %s2022_s14 = sphi %s2108_s14, %s27_s14   ;;  %s2018_s13 = sphi %s2106_s13, %s2938_s13   ;;  %s2014_s12 = sphi %s2104_s12, %s2937_s12   ;;  %s2010_s11 = sphi %s2102_s11, %s2936_s11   ;;  %s2006_s10 = sphi %s2100_s10, %s2923_s10   ;;  %s2002_s9 = sphi %s2098_s9, %s2935_s9   ;;  %s1998_s8 = sphi %s2096_s8, %s2934_s8   ;;  %s1994_s7 = sphi %s2094_s7, %s2920_s7   ;;  %s1990_s6 = sphi %s2092_s6, %s2933_s6   ;;  %s1986_s30 = sphi %s2090_s30, %s2932_s30   ;;  %s1982_s29 = sphi %s2088_s29, %s2918_s29   ;;  %s1978_s28 = sphi %s2086_s28, %s2917_s28   ;;  %s1974_s27 = sphi %s2084_s27, %s2916_s27   ;;  %s1970_s26 = sphi %s2082_s26, %s2931_s26   ;;  %s1966_s25 = sphi %s2080_s25, %s2930_s25   ;;  %s1962_s24 = sphi %s2078_s24, %s2913_s24   ;;  %s1958_s23 = sphi %s2076_s23, %s2928_s23   ;;  %s1954_s22 = sphi %s2074_s22, %s2912_s22   ;;  %s1950_s21 = sphi %s2072_s21, %s2911_s21   ;;  %s1946_s20 = sphi %s2070_s20, %s2924_s20   ;;  %s1942_s19 = sphi %s2068_s19, %s2922_s19   ;;  %s1938_s18 = sphi %s2066_s18, %s2921_s18  }
  0x1a   : > { %2820 = sst [smem:[#allocation19_spill]] %s1950_s21  ;;  %s39_s16 = sadd.s32 1, %s2010_s11 }
  0x1b   : > { %2821 = sst [smem:[#allocation20_spill]] %s1954_s22  ;;  %p40_p0 = scmp.ge.s32.totalorder %s39_s16, 2 }
  0x1c   : > { %2822 = sst [smem:[#allocation21_spill]] %s1958_s23  ;;  %s42_s17 = sadd.s32 1, %s2014_s12 }
  0x1d   : > { %2823 = sst [smem:[#allocation22_spill]] %s1962_s24  ;;  %p2790_p1 = scmp.eq.s32.totalorder %s2022_s14, 0 }
  0x1e   : > { %2824 = sst [smem:[#allocation23_spill]] %s1966_s25  ;;  %p2789_p2 = scmp.eq.s32.totalorder %s2175_s15, 0 }
  0x1f   : > { %2825 = sst [smem:[#allocation24_spill]] %s1970_s26  ;;  %s2940_s16 = smov (%p40_p0, %s39_s16), 0 }
  0x20   : > { %2826 = sst [smem:[#allocation25_spill]] %s1978_s28  ;;  %s2942_s17 = smov (!%p40_p0, %s42_s17), %s2014_s12 }
  0x21   : > { %2827 = sst [smem:[#allocation26_spill]] %s1982_s29  ;;  %s2188_s5 = ssub.s32 %s2010_s11, %s2940_s16 }
  0x22   : > { %2828 = sst [smem:[#allocation27_spill]] %s1994_s7  ;;  %p2791_p3 = scmp.ge.s32.totalorder %s2942_s17, 2 }
  0x23   : > { %2829 = sst [smem:[#allocation28_spill]] %s1998_s8  ;;  %p90_p4 = scmp.ne.s32.totalorder %s1982_s29, %s1978_s28 }
  0x24   : > { %2830 = sst [smem:[#allocation29_spill]] %s2002_s9  ;;  %p96_p5 = scmp.ne.s32.totalorder %s1978_s28, %s1974_s27 }
  0x25   : > { %2831 = sst [smem:[#allocation30_spill]] %s2006_s10  ;;  %s83_s10 = sadd.s32 1, %s1982_s29 }
  0x26   : > { %2832 = sst [smem:[#allocation31_spill]] %s2018_s13  ;;  %p2203_p7 = por %p90_p4, %p2790_p1 }
  0x27   : > { %2833 = sst [smem:[#allocation32_spill]] %s2940_s16  ;;  %p2209_p8 = por %p96_p5, %p2789_p2 }
  0x28   : > { %s2199_s4 = scalar_select %p2791_p3, 0, %s2942_s17  }
  0x29   : > { %s2836_s16 = scalar_select %p2209_p8, 1, 0 }
  0x2a   : > { %2834 = sst [smem:[#allocation33_spill]] %s2199_s4  ;;  %s2215_s9 = ssub.s32 %s2014_s12, %s2199_s4 }
  0x2b   : > { %2837 = sst [smem:[#allocation34_spill]] %s2836_s16  ;;  %s80_s27 = sor.u32 %s2215_s9, %s2188_s5 }
  0x2c   : > { %p2788_p9 = scmp.lt.s32.totalorder %s2022_s14, 8  ;;  %p81_p10 = scmp.eq.s32.totalorder %s80_s27, 0 }
  0x2d   : > { %s249_s3 = sand.u32 1, %s2022_s14   ;;  %s251_s21 = sand.u32 1, %s1982_s29  }
  0x2e   : > { %s2221_s28 = scalar_select %p81_p10, %s1982_s29, %s83_s10  }
  0x2f   : > { %s1091_s22 = sshll.u32 %s251_s21, 7  ;;  %s1117_s23 = sshll.u32 %s2010_s11, 5 }
  0x30   : > { %2838 = sst [smem:[#allocation35_spill]] %s2221_s28  ;;  %s259_s2 = sadd.s32 %s2014_s12, %s1117_s23 }
  0x31   : > { %s253_s24 = scalar_lea.vmem [#allocation7], %s1091_s22  ;;  %s1094_s16 = sshll.u32 %s259_s2, 7 }
  0x32   : > { %s262_s25 = sshll.u32 %s253_s24, 4  ;;  %s2839_s1 = sld [smem:[#allocation42_spill]]  ;;  %s2227_s25 = int_to_ptr.vmem [resolvable:$true] %s262_s25 }
  0x33   : > { %p2238_p11 = pnand %p2788_p9, %p2203_p7  ;;  %s2244_s2 = scalar_lea.sflag [#allocation8], %s249_s3 }
  0x35   : > { %p1682_p4 = pneg %p2238_p11 }
  0x38   : > { %s2232_s0 = scalar_lea.hbm %s2839_s1, %s1094_s16  ;;  %s1685_s24 = scalar_lea.hbm %s2839_s1, 8192 }
  0x39   : > { %s1680_s22 = scalar_lea.hbm %s2232_s0, 2048  ;;  %p1686_p7 = scmp.lt.u32.totalorder %s2232_s0, %s2839_s1 }
  0x3a   : > { %p1681_p0 = scmp.ne.s32.totalorder %s2232_s0, %s1680_s22  ;;  %p1687_p9 = scmp.lt.u32.totalorder %s1685_s24, %s1680_s22 }
  0x3b   : > { %p1689_p2 = scmp.lt.u32.totalorder %s1680_s22, %s2232_s0 }
  0x3c   : > { %p1683_p5 = pnand %p1682_p4, %p1681_p0  ;;  %p1688_p6 = por %p1687_p9, %p1686_p7 }
  0x3e   : > { %p1684_p10 = pneg %p1683_p5  ;;  %p1690_p1 = por %p1689_p2, %p1688_p6 }
  0x40   : > { %p1691_p3 = pnand %p1690_p1, %p1684_p10 }
  0x42   : > { %1694 = shalt.err (!%p1691_p3)
}
  0x43   : > { %s1695_s3 = scalar_lea.vmem %s2227_s25, 2048  ;;  %s2024_s10 = smov [#allocation7]  }
  0x44   : > { %p1696_p0 = scmp.ne.s32.totalorder %s2227_s25, %s1695_s3  ;;  %s1700_s16 = sshll.u32 %s2024_s10, 4  ;;  %s1701_s16 = int_to_ptr.vmem [resolvable:$false] %s1700_s16 }
  0x45   : > { %s1702_s27 = scalar_lea.vmem %s1701_s16, 4096  ;;  %p1703_p13 = scmp.lt.s32.totalorder %s2227_s25, %s1701_s16 }
  0x46   : > { %p1698_p5 = pnand %p1696_p0, %p1682_p4  ;;  %p1704_p9 = scmp.lt.s32.totalorder %s1702_s27, %s1695_s3 }
  0x48   : > { %p1699_p12 = pneg %p1698_p5  ;;  %p1705_p7 = por %p1704_p9, %p1703_p13 }
  0x4a   : > { %p1706_p2 = pnand %p1705_p7, %p1699_p12 }
  0x4c   : > { %1709 = shalt.err (!%p1706_p2)
}
  0x4d   : > { %s2792_s22 = smov 256   ;;  %s2794_s4 = smov 128  }
  0x4e   : > { %s2796_s23 = smov 8   ;;  %p2841_p1 = scmp.lt.s32.totalorder %s2022_s14, 9 }
  0x4f   : > { %1484 = dma.hbm_to_vmem [thread:$0]  (!%p2238_p11), %s2232_s0, 2048, %s2227_s25, %s2244_s2, %s2792_s22, %s2794_s4, %s2796_s23  }
  0x50   : > { %p2842_p3 = scmp.ge.s32.totalorder %s2022_s14, 1  ;;  %s1084_s26 = sadd.s32 4294967294, %s2022_s14  }
  0x51   : > { %s46_s8 = sadd.s32 1, %s2018_s13  ;;  %p2844_p12 = scmp.ge.s32.totalorder %s2942_s17, 2 }
  0x52   : > { %p2279_p6 = pnand %p2842_p3, %p2841_p1  ;;  %s55_s21 = sadd.s32 1, %s1994_s7 }
  0x53   : > { %s2944_s8 = smov (!%p2844_p12, %s46_s8), %s2018_s13  ;;  %p62_p13 = scmp.ne.s32.totalorder %s1994_s7, %s1990_s6 }
  0x54   : > { %p48_p4 = scmp.ge.s32.totalorder %s2944_s8, 2  ;;  %p68_p10 = scmp.ne.s32.totalorder %s1990_s6, %s1986_s30 }
  0x55   : > { %p2845_p11 = scmp.eq.s32.totalorder %s2022_s14, 0  ;;  %s189_s25 = sadd.s32 1, %s1946_s20 }
  0x56   : > { %s2946_s8 = smov (%p48_p4, %s2944_s8), 0  ;;  %p2848_p5 = scmp.eq.s32.totalorder %s2175_s15, 0 }
  0x57   : > { %p2295_p0 = por %p2845_p11, %p62_p13  ;;  %2847 = sst [smem:[#allocation36_spill]] %s2946_s8 }
  0x58   : > { %p2304_p9 = por %p2848_p5, %p68_p10  ;;  %p199_p7 = scmp.ne.s32.totalorder %s1946_s20, %s1942_s19 }
  0x59   : > { %s50_s3 = ssub.s32 %s2018_s13, %s2946_s8  ;;  %p205_p2 = scmp.ne.s32.totalorder %s1942_s19, %s1938_s18 }
  0x5a   : > { %s2849_s17 = scalar_select %p2304_p9, 1, 0 }
  0x5b   : > { %s52_s30 = sor.u32 %s2188_s5, %s50_s3  ;;  %s186_s10 = sor.u32 %s2215_s9, %s50_s3 }
  0x5c   : > { %p53_p1 = scmp.eq.s32.totalorder %s52_s30, 0  ;;  %p187_p3 = scmp.eq.s32.totalorder %s186_s10, 0 }
  0x5d   : > { %p2850_p12 = scmp.eq.s32.totalorder %s2175_s15, 7  ;;  %p206_p4 = scmp.eq.s32.totalorder %s1084_s26, 7 }
  0x5e   : > { %s2323_s27 = scalar_select %p53_p1, %s1994_s7, %s55_s21  }
  0x5f   : > { %p2318_p13 = por %p2850_p12, %p199_p7  ;;  %p2328_p10 = por %p206_p4, %p205_p2 }
  0x60   : > { %2853 = sst [smem:[#allocation38_spill]] %s2323_s27  ;;  %s226_s23 = sand.u32 1, %s1994_s7  }
  0x61   : > { %s2851_s16 = scalar_select %p2318_p13, 1, 0 }
  0x62   : > { %s2326_s22 = scalar_select %p187_p3, %s1946_s20, %s189_s25  }
  0x63   : > { %2852 = sst [smem:[#allocation37_spill]] %s2851_s16  ;;  %s1087_s3 = sshll.u32 %s226_s23, 6 }
  0x64   : > { %2854 = sst [smem:[#allocation39_spill]] %s2326_s22  ;;  %s1116_s30 = sshll.u32 %s2018_s13, 4 }
  0x65   : > { %s2855_s4 = scalar_select %p2328_p10, 1, 0 }
  0x66   : > { %s236_s1 = sadd.s32 %s2010_s11, %s1116_s30  ;;  %s230_s8 = scalar_lea.vmem [#allocation4], %s1087_s3 }
  0x67   : > { %2856 = sst [smem:[#allocation40_spill]] %s2855_s4  ;;  %s239_s10 = sshll.u32 %s230_s8, 4  ;;  %s2335_s10 = int_to_ptr.vmem [resolvable:$true] %s239_s10 }
  0x68   : > { %s1090_s28 = sshll.u32 %s236_s1, 7  ;;  %s2857_s26 = sld [smem:[#allocation41_spill]] }
  0x69   : > { %p2859_p11 = scmp.lt.s32.totalorder %s2022_s14, 8  ;;  %s2350_s1 = scalar_lea.sflag [#allocation5], %s226_s23 }
  0x6b   : > { %p2346_p5 = pnand %p2859_p11, %p2295_p0 }
  0x6d   : > { %p1712_p2 = pneg %p2346_p5 }
  0x6e   : > { %s2858_s16 = smov %s2857_s26  ;;  %s2340_s21 = scalar_lea.hbm %s2857_s26, %s1090_s28 }
  0x6f   : > { %s1710_s8 = scalar_lea.hbm %s2340_s21, 1024  ;;  %s1715_s29 = scalar_lea.hbm %s2858_s16, 4096 }
  0x70   : > { %p1711_p7 = scmp.ne.s32.totalorder %s2340_s21, %s1710_s8  ;;  %p1716_p0 = scmp.lt.u32.totalorder %s2340_s21, %s2858_s16 }
  0x71   : > { %p1717_p12 = scmp.lt.u32.totalorder %s1715_s29, %s1710_s8  ;;  %p1719_p11 = scmp.lt.u32.totalorder %s1710_s8, %s2340_s21 }
  0x72   : > { %p1713_p1 = pnand %p1712_p2, %p1711_p7 }
  0x73   : > { %p1718_p4 = por %p1717_p12, %p1716_p0 }
  0x74   : > { %p1714_p3 = pneg %p1713_p1 }
  0x75   : > { %p1720_p10 = por %p1719_p11, %p1718_p4 }
  0x77   : > { %p1721_p13 = pnand %p1720_p10, %p1714_p3 }
  0x79   : > { %1724 = shalt.err (!%p1721_p13)
}
  0x7a   : > { %s1725_s23 = scalar_lea.vmem %s2335_s10, 1024  ;;  %s2028_s30 = smov [#allocation4]  }
  0x7b   : > { %p1726_p7 = scmp.ne.s32.totalorder %s2335_s10, %s1725_s23  ;;  %s1730_s26 = sshll.u32 %s2028_s30, 4  ;;  %s1731_s26 = int_to_ptr.vmem [resolvable:$false] %s1730_s26 }
  0x7c   : > { %s1732_s18 = scalar_lea.vmem %s1731_s26, 2048  ;;  %p1733_p9 = scmp.lt.s32.totalorder %s2335_s10, %s1731_s26 }
  0x7d   : > { %p1728_p1 = pnand %p1726_p7, %p1712_p2  ;;  %p1734_p0 = scmp.lt.s32.totalorder %s1732_s18, %s1725_s23 }
  0x7f   : > { %p1729_p8 = pneg %p1728_p1  ;;  %p1735_p12 = por %p1734_p0, %p1733_p9 }
  0x81   : > { %p1736_p4 = pnand %p1735_p12, %p1729_p8 }
  0x83   : > { %1739 = shalt.err (!%p1736_p4)
}
  0x84   : > { %s2861_s8 = smov 8   ;;  %s2862_s28 = smov 128  }
  0x85   : > { %s2863_s29 = smov 256   ;;  %s2864_s0 = sld [smem:[#allocation24_spill]] }
  0x86   : > { %s2865_s3 = sld [smem:[#allocation23_spill]]  ;;  %s2866_s30 = sld [smem:[#allocation22_spill]] }
  0x87   : > { %1481 = dma.hbm_to_vmem [thread:$0]  (!%p2346_p5), %s2340_s21, 1024, %s2335_s10, %s2350_s1, %s2863_s29, %s2862_s28, %s2861_s8  }
  0x88   : > { %p107_p8 = scmp.eq.s32.totalorder %s2188_s5, 0  ;;  %p2867_p13 = scmp.eq.s32.totalorder %s2022_s14, 0 }
  0x89   : > { %s1118_s18 = sshll.u32 %s2010_s11, 11  ;;  %p2868_p3 = scmp.eq.s32.totalorder %s2175_s15, 0 }
  0x8a   : > { %s2870_s22 = sld [smem:[#allocation43_spill]]  ;;  %p2872_p5 = scmp.lt.s32.totalorder %s2022_s14, 8 }
  0x8b   : > { %s109_s25 = sadd.s32 1, %s2864_s0  ;;  %s274_s26 = sand.u32 1, %s2864_s0  }
  0x8c   : > { %p116_p9 = scmp.ne.s32.totalorder %s2864_s0, %s2865_s3  ;;  %p122_p2 = scmp.ne.s32.totalorder %s2865_s3, %s2866_s30 }
  0x8d   : > { %s2386_s23 = scalar_select %p107_p8, %s2864_s0, %s109_s25  }
  0x8e   : > { %p118_p10 = por %p116_p9, %p2867_p13  ;;  %p2396_p11 = por %p122_p2, %p2868_p3 }
  0x8f   : > { %s1095_s13 = sshll.u32 %s274_s26, 7 }
  0x90   : > { %s2869_s16 = scalar_select %p2396_p11, 1, 0 }
  0x91   : > { %s2871_s4 = smov %s2870_s22  ;;  %s2403_s10 = scalar_lea.hbm %s2870_s22, %s1118_s18 }
  0x92   : > { %s276_s5 = scalar_lea.vmem [#allocation9], %s1095_s13  ;;  %p2407_p7 = pnand %p2872_p5, %p118_p10 }
  0x93   : > { %s283_s21 = sshll.u32 %s276_s5, 4  ;;  %s1740_s0 = scalar_lea.hbm %s2403_s10, 2048  ;;  %s2411_s21 = int_to_ptr.vmem [resolvable:$true] %s283_s21 }
  0x94   : > { %p1741_p1 = scmp.ne.s32.totalorder %s2403_s10, %s1740_s0  ;;  %p1742_p0 = pneg %p2407_p7 }
  0x95   : > { %s1745_s22 = scalar_lea.hbm %s2871_s4, 4096  ;;  %p1746_p8 = scmp.lt.u32.totalorder %s2403_s10, %s2871_s4 }
  0x96   : > { %p1743_p12 = pnand %p1742_p0, %p1741_p1  ;;  %p1747_p9 = scmp.lt.u32.totalorder %s1745_s22, %s1740_s0 }
  0x97   : > { %p1749_p10 = scmp.lt.u32.totalorder %s1740_s0, %s2403_s10 }
  0x98   : > { %p1744_p4 = pneg %p1743_p12  ;;  %p1748_p13 = por %p1747_p9, %p1746_p8 }
  0x9a   : > { %p1750_p2 = por %p1749_p10, %p1748_p13 }
  0x9c   : > { %p1751_p3 = pnand %p1750_p2, %p1744_p4 }
  0x9e   : > { %1754 = shalt.err (!%p1751_p3)
}
  0x9f   : > { %s1755_s30 = scalar_lea.vmem %s2411_s21, 2048  ;;  %s2029_s25 = smov [#allocation9]  }
  0xa0   : > { %p1756_p5 = scmp.ne.s32.totalorder %s2411_s21, %s1755_s30  ;;  %s1760_s26 = sshll.u32 %s2029_s25, 4  ;;  %s1761_s26 = int_to_ptr.vmem [resolvable:$false] %s1760_s26 }
  0xa1   : > { %s1762_s18 = scalar_lea.vmem %s1761_s26, 4096  ;;  %p1763_p11 = scmp.lt.s32.totalorder %s2411_s21, %s1761_s26 }
  0xa2   : > { %p1758_p1 = pnand %p1756_p5, %p1742_p0  ;;  %p1764_p8 = scmp.lt.s32.totalorder %s1762_s18, %s1755_s30 }
  0xa4   : > { %p1759_p12 = pneg %p1758_p1  ;;  %p1765_p9 = por %p1764_p8, %p1763_p11 }
  0xa6   : > { %p1766_p13 = pnand %p1765_p9, %p1759_p12 }
  0xa8   : > { %1769 = shalt.err (!%p1766_p13)
}
  0xa9   : > { %s2874_s5 = sld [smem:[#allocation21_spill]]  ;;  %s2875_s0 = sld [smem:[#allocation20_spill]] }
  0xaa   : > { %s2876_s7 = sld [smem:[#allocation19_spill]]  ;;  %p133_p11 = scmp.eq.s32.totalorder %s2215_s9, 0 }
  0xab   : > { %1487 = dma.hbm_to_vmem [thread:$0]  (!%p2407_p7), %s2403_s10, 2048, %s2411_s21, %s2244_s2, %s2862_s28, %s2862_s28, %s2861_s8  }
  0xac   : > { %p2877_p10 = scmp.eq.s32.totalorder %s2022_s14, 0  ;;  %p2878_p3 = scmp.eq.s32.totalorder %s2175_s15, 0 }
  0xad   : > { %s1099_s3 = sshll.u32 %s2014_s12, 7  ;;  %s2880_s18 = sld [smem:[#allocation44_spill]] }
  0xae   : > { %p2882_p7 = scmp.lt.s32.totalorder %s2022_s14, 8 }
  0xaf   : > { %s135_s1 = sadd.s32 1, %s2874_s5  ;;  %p142_p0 = scmp.ne.s32.totalorder %s2874_s5, %s2875_s0 }
  0xb0   : > { %p148_p4 = scmp.ne.s32.totalorder %s2875_s0, %s2876_s7  ;;  %s293_s27 = sand.u32 1, %s2874_s5  }
  0xb1   : > { %s2449_s13 = scalar_select %p133_p11, %s2874_s5, %s135_s1  }
  0xb2   : > { %p144_p2 = por %p142_p0, %p2877_p10  ;;  %p2455_p5 = por %p148_p4, %p2878_p3 }
  0xb3   : > { %s1098_s30 = sshll.u32 %s293_s27, 7  ;;  %s2881_s4 = smov %s2880_s18 }
  0xb4   : > { %s2879_s22 = scalar_select %p2455_p5, 1, 0 }
  0xb5   : > { %s2464_s2 = scalar_lea.hbm %s2880_s18, %s1099_s3  ;;  %s297_s9 = scalar_lea.vmem [#allocation10], %s1098_s30 }
  0xb6   : > { %s303_s10 = sshll.u32 %s297_s9, 4  ;;  %p2468_p1 = pnand %p2882_p7, %p144_p2  ;;  %s2472_s10 = int_to_ptr.vmem [resolvable:$true] %s303_s10 }
  0xb7   : > { %s2474_s5 = scalar_lea.sflag [#allocation11], %s293_s27  ;;  %s1770_s0 = scalar_lea.hbm %s2464_s2, 2048 }
  0xb8   : > { %p1771_p12 = scmp.ne.s32.totalorder %s2464_s2, %s1770_s0  ;;  %p1772_p8 = pneg %p2468_p1 }
  0xb9   : > { %s1775_s3 = scalar_lea.hbm %s2881_s4, 4096  ;;  %p1776_p11 = scmp.lt.u32.totalorder %s2464_s2, %s2881_s4 }
  0xba   : > { %p1773_p9 = pnand %p1772_p8, %p1771_p12  ;;  %p1777_p0 = scmp.lt.u32.totalorder %s1775_s3, %s1770_s0 }
  0xbb   : > { %p1779_p10 = scmp.lt.u32.totalorder %s1770_s0, %s2464_s2 }
  0xbc   : > { %p1774_p13 = pneg %p1773_p9  ;;  %p1778_p4 = por %p1777_p0, %p1776_p11 }
  0xbe   : > { %p1780_p2 = por %p1779_p10, %p1778_p4 }
  0xc0   : > { %p1781_p3 = pnand %p1780_p2, %p1774_p13 }
  0xc2   : > { %1784 = shalt.err (!%p1781_p3)
}
  0xc3   : > { %s1785_s27 = scalar_lea.vmem %s2472_s10, 2048  ;;  %s2030_s26 = smov [#allocation10]  }
  0xc4   : > { %p1786_p7 = scmp.ne.s32.totalorder %s2472_s10, %s1785_s27  ;;  %s1790_s18 = sshll.u32 %s2030_s26, 4  ;;  %s1791_s18 = int_to_ptr.vmem [resolvable:$false] %s1790_s18 }
  0xc5   : > { %s1792_s9 = scalar_lea.vmem %s1791_s18, 4096  ;;  %p1793_p5 = scmp.lt.s32.totalorder %s2472_s10, %s1791_s18 }
  0xc6   : > { %p1788_p12 = pnand %p1786_p7, %p1772_p8  ;;  %p1794_p11 = scmp.lt.s32.totalorder %s1792_s9, %s1785_s27 }
  0xc8   : > { %p1789_p9 = pneg %p1788_p12  ;;  %p1795_p0 = por %p1794_p11, %p1793_p5 }
  0xca   : > { %p1796_p4 = pnand %p1795_p0, %p1789_p9 }
  0xcc   : > { %1799 = shalt.err (!%p1796_p4)
}
  0xcd   : > { %1490 = dma.hbm_to_vmem [thread:$0]  (!%p2468_p1), %s2464_s2, 2048, %s2472_s10, %s2474_s5, %s2863_s29, %s2862_s28, %s2861_s8  }
  0xce   : > { %321 = sbr.rel (%p2279_p6) target bundleno = 1069 (0x42d), region = 40  ;;  %s323_s0 = sand.u32 (!%p2279_p6), 1, %s1990_s6  }
  0xcf   : > { %s1101_s7 = sshll.u32 (!%p2279_p6), %s323_s0, 6  ;;  %s324_s1 = scalar_lea.sflag (!%p2279_p6), [#allocation5], %s323_s0 }
  0xd0   : > { %s2508_s3 = scalar_lea.vmem (!%p2279_p6), [#allocation4], %s1101_s7  ;;  %p2884_p5 = scmp.ne.s32.totalorder (!%p2279_p6), %s2849_s17, 0 }
  0xd5   : > { %1917 = dma.done.wait (%p2884_p5), %s324_s1, 1024  }
  0xd6   : > { %1919 = vsyncadd (%p2884_p5), %s324_s1, 4294966272  ;;  %s2885_s21 = sld [smem:[#allocation25_spill]]  ;;  %s332_s25 = sand.u32 1, %s2175_s15  }
  0xd7   : > { %s2886_s30 = sld [smem:[#allocation34_spill]]  ;;  %s333_s24 = scalar_lea.sflag [#allocation8], %s332_s25 }
  0xdc   : > { %s334_s8 = sand.u32 1, %s2885_s21  }
  0xdd   : > { %s1102_s28 = sshll.u32 %s334_s8, 7  ;;  %p2887_p6 = scmp.ne.s32.totalorder %s2886_s30, 0 }
  0xde   : > { %s2516_s29 = scalar_lea.vmem [#allocation7], %s1102_s28 }
  0xdf   : > { %1921 = dma.done.wait (%p2887_p6), %s333_s24, 2048  }
  0xe0   : > { %1923 = vsyncadd (%p2887_p6), %s333_s24, 4294965248  ;;  %s2888_s2 = sld [smem:[#allocation23_spill]]  ;;  %p2889_p1 = scmp.ne.s32.totalorder %s2869_s16, 0 }
  0xe6   : > { %s343_s10 = sand.u32 1, %s2888_s2  }
  0xe7   : > { %s1103_s5 = sshll.u32 %s343_s10, 7 }
  0xe8   : > { %s2523_s17 = scalar_lea.vmem [#allocation9], %s1103_s5 }
  0xe9   : > { %1925 = dma.done.wait (%p2889_p1), %s333_s24, 2048  }
  0xea   : > { %1927 = vsyncadd (%p2889_p1), %s333_s24, 4294965248  ;;  %s2890_s15 = sld [smem:[#allocation20_spill]]  ;;  %p2891_p8 = scmp.ne.s32.totalorder %s2879_s22, 0 }
  0xf0   : > { %s350_s27 = sand.u32 1, %s2890_s15  }
  0xf1   : > { %s1104_s26 = sshll.u32 %s350_s27, 7  ;;  %s351_s18 = scalar_lea.sflag [#allocation11], %s350_s27 }
  0xf2   : > { %s2530_s9 = scalar_lea.vmem [#allocation10], %s1104_s26 }
  0xf3   : > { %1929 = dma.done.wait (%p2891_p8), %s351_s18, 2048  }
  0xf4   : > { %1931 = vsyncadd (%p2891_p8), %s351_s18, 4294965248  ;;  %s2892_s0 = sld [smem:[#allocation29_spill]]  ;;  %s2893_s7 = sld [smem:[#allocation28_spill]] }
  0xf5   : > { %s396_s1 = sand.u32 1, %s1942_s19   ;;  %s2894_s25 = sld [smem:[#allocation45_spill]] }
  0xf6   : > { %s1105_s16 = sshll.u32 %s396_s1, 6 }
  0xf7   : > { %s2545_s28 = scalar_lea.vmem [#allocation12], %s1105_s16 }
  0xfa   : > { %p402_p13 = scmp.lt.s32.totalorder %s2892_s0, 1  ;;  %p406_p10 = scmp.eq.s32.totalorder %s2893_s7, 0 }
  0xfb   : > { %p1106_p2 = scmp.ne.s32.totalorder %s2893_s7, 0 }
  0xfc   : > { %s2948_s0 = smov (!%p402_p13, %s2892_s0), 1 }
  0xfd   : > { %s404_s8 = scalar_lea.vmem %s2894_s25, %s2948_s0  ;;  %409 = sbr.rel (%p1106_p2) target bundleno = 260 (0x104), region = 60 }
  0xfe   : > { %v1107_v0 = vld [vmem:[%s404_s8] ss:$0 sm:$0xff] (!%p1106_p2) }
  0xff   : > { %417 = vst [vmem:[#allocation2] sm:$0xff] (!%p1106_p2), %v1107_v0  ;;  %418 = vst [vmem:[#allocation2 + $0x8] sm:$0xff] (!%p1106_p2), %v1107_v0 }
 0x100   : > { %419 = vst [vmem:[#allocation2 + $0x10] sm:$0xff] (!%p1106_p2), %v1107_v0  ;;  %420 = vst [vmem:[#allocation2 + $0x18] sm:$0xff] (!%p1106_p2), %v1107_v0 }
 0x101   : > { %421 = vst [vmem:[#allocation2 + $0x20] sm:$0xff] (!%p1106_p2), %v1107_v0  ;;  %422 = vst [vmem:[#allocation2 + $0x28] sm:$0xff] (!%p1106_p2), %v1107_v0 }
 0x102   : > { %423 = vst [vmem:[#allocation2 + $0x30] sm:$0xff] (!%p1106_p2), %v1107_v0  ;;  %424 = vst [vmem:[#allocation2 + $0x38] sm:$0xff] (!%p1106_p2), %v1107_v0 }
 0x104 PF: > { %v441_v1 = vld [vmem:[%s2516_s29] sm:$0xff]  ;;  %v442_v2 = vld [vmem:[%s2516_s29 + $0x8] sm:$0xff]  ;;  %v443_v3 = vld [vmem:[%s2516_s29 + $0x10] sm:$0xff]  ;;  %s2895_s22 = sld [smem:[#allocation29_spill]] }
 0x105   : > { %v1324_v4 = vpack.c.bf16 %v442_v2, %v441_v1  ;;  %v444_v5 = vld [vmem:[%s2516_s29 + $0x18] sm:$0xff]  ;;  %v445_v7 = vld [vmem:[%s2516_s29 + $0x20] sm:$0xff]  ;;  %v446_v8 = vld [vmem:[%s2516_s29 + $0x28] sm:$0xff] }
 0x106   : > { %v1328_v6 = vpack.c.bf16 %v444_v5, %v443_v3  ;;  %v1332_v9 = vpack.c.bf16 %v446_v8, %v445_v7  ;;  %v2555_v10 = vld [vmem:[%s2508_s3] sm:$0xff]  ;;  %v447_v12 = vld [vmem:[%s2516_s29 + $0x30] sm:$0xff]  ;;  %v448_v13 = vld [vmem:[%s2516_s29 + $0x38] sm:$0xff] }
 0x107   : > { %1325 = vmatprep.subr.bf16.mxu0 %v1324_v4  ;;  %1420 = vmatprep.subr.bf16.mxu1 %v1324_v4  ;;  %v2558_v11 = vld [vmem:[%s2508_s3 + $0x20] sm:$0xff]  ;;  %v1336_v14 = vpack.c.bf16 %v448_v13, %v447_v12  ;;  %v450_v16 = vld [vmem:[%s2516_s29 + $0x48] sm:$0xff]  ;;  %v451_v18 = vld [vmem:[%s2516_s29 + $0x50] sm:$0xff] }
 0x108   : > { %1327 = vmatpush3.bf16.msra.mxu0 %v1324_v4  ;;  %1428 = vmatpush3.bf16.msra.mxu1 %v1324_v4  ;;  %v449_v15 = vld [vmem:[%s2516_s29 + $0x40] sm:$0xff]  ;;  %v452_v19 = vld [vmem:[%s2516_s29 + $0x58] sm:$0xff]  ;;  %v454_v22 = vld [vmem:[%s2516_s29 + $0x68] sm:$0xff] }
 0x109   : > { %1329 = vmatprep.subr.bf16.mxu0 %v1328_v6  ;;  %1421 = vmatprep.subr.bf16.mxu1 %v1328_v6  ;;  %v1340_v17 = vpack.c.bf16 %v450_v16, %v449_v15  ;;  %v1344_v20 = vpack.c.bf16 %v452_v19, %v451_v18  ;;  %v453_v21 = vld [vmem:[%s2516_s29 + $0x60] sm:$0xff]  ;;  %v455_v24 = vld [vmem:[%s2516_s29 + $0x70] sm:$0xff]  ;;  %v456_v25 = vld [vmem:[%s2516_s29 + $0x78] sm:$0xff] }
 0x10a   : > { %1224 = vmatprep.mubr.f32.mxu0 %v2555_v10  ;;  %1230 = vmatprep.mubr.f32.mxu1 %v2558_v11  ;;  %v1348_v23 = vpack.c.bf16 %v454_v22, %v453_v21  ;;  %v1352_v26 = vpack.c.bf16 %v456_v25, %v455_v24  ;;  %v2573_v27 = vld [vmem:[%s2508_s3 + $0x8] sm:$0xff]  ;;  %v2579_v29 = vld [vmem:[%s2508_s3 + $0x10] sm:$0xff]  ;;  %v2589_v31 = vld [vmem:[%s2508_s3 + $0x18] sm:$0xff]  ;;  %p578_p3 = scmp.eq.s32.totalorder %s2895_s22, 0 }
 0x10b   : > { %v2576_v28 = vld [vmem:[%s2508_s3 + $0x28] sm:$0xff]  ;;  %v2582_v30 = vld [vmem:[%s2508_s3 + $0x30] sm:$0xff]  ;;  %v2592_v32 = vld [vmem:[%s2508_s3 + $0x38] sm:$0xff] }
 0x10c   : > { %1331 = vmatpush3.bf16.msra.mxu0 %v1328_v6  ;;  %1429 = vmatpush3.bf16.msra.mxu1 %v1328_v6  ;;  %p2599_p7 = pnand %p578_p3, %p406_p10  ;;  %v434_v33 = vld [vmem:[#allocation2 + $0x8] sm:$0xff]  ;;  %v433_v35 = vld [vmem:[#allocation2] sm:$0xff]  ;;  %v436_v45 = vld [vmem:[#allocation2 + $0x18] sm:$0xff] }
 0x10d   : > { %1333 = vmatprep.subr.bf16.mxu0 %v1332_v9  ;;  %1422 = vmatprep.subr.bf16.mxu1 %v1332_v9  ;;  %v438_v34 = vld [vmem:[#allocation2 + $0x28] sm:$0xff]  ;;  %v437_v36 = vld [vmem:[#allocation2 + $0x20] sm:$0xff]  ;;  %v440_v46 = vld [vmem:[#allocation2 + $0x38] sm:$0xff]  ;;  %v2031_v57 = vmov (!%p2599_p7), 0.0  }
 0x10e   : > { %v435_v47 = vld [vmem:[#allocation2 + $0x10] sm:$0xff]  ;;  %583 = vst [vmem:[#allocation3] sm:$0xff] (!%p2599_p7), %v2031_v57  ;;  %584 = vst [vmem:[#allocation3 + $0x8] sm:$0xff] (!%p2599_p7), %v2031_v57 }
 0x10f   : > { %v439_v48 = vld [vmem:[#allocation2 + $0x30] sm:$0xff]  ;;  %585 = vst [vmem:[#allocation3 + $0x10] sm:$0xff] (!%p2599_p7), %v2031_v57  ;;  %586 = vst [vmem:[#allocation3 + $0x18] sm:$0xff] (!%p2599_p7), %v2031_v57 }
 0x110   : > { %1335 = vmatpush3.bf16.msra.mxu0 %v1332_v9  ;;  %1430 = vmatpush3.bf16.msra.mxu1 %v1332_v9  ;;  %587 = vst [vmem:[#allocation3 + $0x20] sm:$0xff] (!%p2599_p7), %v2031_v57  ;;  %588 = vst [vmem:[#allocation3 + $0x28] sm:$0xff] (!%p2599_p7), %v2031_v57 }
 0x111   : > { %1337 = vmatprep.subr.bf16.mxu0 %v1336_v14  ;;  %1423 = vmatprep.subr.bf16.mxu1 %v1336_v14  ;;  %589 = vst [vmem:[#allocation3 + $0x30] sm:$0xff] (!%p2599_p7), %v2031_v57  ;;  %590 = vst [vmem:[#allocation3 + $0x38] sm:$0xff] (!%p2599_p7), %v2031_v57 }
 0x114   : > { %1339 = vmatpush3.bf16.msra.mxu0 %v1336_v14  ;;  %1431 = vmatpush3.bf16.msra.mxu1 %v1336_v14 }
 0x115   : > { %1341 = vmatprep.subr.bf16.mxu0 %v1340_v17  ;;  %1424 = vmatprep.subr.bf16.mxu1 %v1340_v17 }
 0x118   : > { %1343 = vmatpush3.bf16.msra.mxu0 %v1340_v17  ;;  %1432 = vmatpush3.bf16.msra.mxu1 %v1340_v17 }
 0x119   : > { %1345 = vmatprep.subr.bf16.mxu0 %v1344_v20  ;;  %1425 = vmatprep.subr.bf16.mxu1 %v1344_v20 }
 0x11c   : > { %1347 = vmatpush3.bf16.msra.mxu0 %v1344_v20  ;;  %1433 = vmatpush3.bf16.msra.mxu1 %v1344_v20 }
 0x11d   : > { %1349 = vmatprep.subr.bf16.mxu0 %v1348_v23  ;;  %1426 = vmatprep.subr.bf16.mxu1 %v1348_v23 }
 0x120   : > { %1351 = vmatpush3.bf16.msra.mxu0 %v1348_v23  ;;  %1434 = vmatpush3.bf16.msra.mxu1 %v1348_v23 }
 0x121   : > { %1353 = vmatprep.subr.bf16.mxu0 %v1352_v26  ;;  %1427 = vmatprep.subr.bf16.mxu1 %v1352_v26 }
 0x124   : > { %1355 = vmatpush3.bf16.msra.mxu0 %v1352_v26  ;;  %1435 = vmatpush3.bf16.msra.mxu1 %v1352_v26 }
 0x127   : > { %1225 = vmatmul.mubr.f32.vlgmr.msra.gmra.mrb[0].mxu0 %v2573_v27  ;;  %1231 = vmatmul.mubr.f32.vlgmr.msra.gmra.mrb[0].mxu1 %v2576_v28 }
 0x128   : > { %1227 = vmatprep.mubr.f32.mxu0 %v2579_v29  ;;  %1233 = vmatprep.mubr.f32.mxu1 %v2582_v30 }
 0x12b   : > { %1228 = vmatmul.mubr.f32.gmra.mrb[2].mxu0 %v2589_v31  ;;  %1234 = vmatmul.mubr.f32.gmra.mrb[2].mxu1 %v2592_v32 }
 0x1fa   : > { %v1226_v37 = vpop.f32.mrb[0].mxu0  ;;  %v1232_v38 = vpop.f32.mrb[0].mxu1 }
 0x1fb   : > { %v563_v39 = vadd.f32 %v1226_v37, %v434_v33  ;;  %v567_v40 = vadd.f32 %v1232_v38, %v438_v34  ;;  %v523_v41 = vpop.f32.mrb[1].mxu0  ;;  %v543_v42 = vpop.f32.mrb[1].mxu1 }
 0x1fc   : > { %v562_v43 = vadd.f32 %v523_v41, %v433_v35  ;;  %v566_v44 = vadd.f32 %v543_v42, %v437_v36  ;;  %582 = sbr.rel (%p2599_p7) target bundleno = 515 (0x203), region = 64 }
 0x1fd   : > { %571 = vst [vmem:[#allocation2 + $0x8] sm:$0xff] %v563_v39  ;;  %575 = vst [vmem:[#allocation2 + $0x28] sm:$0xff] %v567_v40 }
 0x1fe   : > { %570 = vst [vmem:[#allocation2] sm:$0xff] %v562_v43  ;;  %574 = vst [vmem:[#allocation2 + $0x20] sm:$0xff] %v566_v44  ;;  %v1229_v49 = vpop.f32.mrb[2].mxu0  ;;  %v1235_v50 = vpop.f32.mrb[2].mxu1 }
 0x1ff   : > { %v565_v51 = vadd.f32 %v1229_v49, %v436_v45  ;;  %v569_v52 = vadd.f32 %v1235_v50, %v440_v46  ;;  %v533_v53 = vpop.f32.mrb[3].mxu0  ;;  %v553_v54 = vpop.f32.mrb[3].mxu1 }
 0x200   : > { %v564_v55 = vadd.f32 %v533_v53, %v435_v47  ;;  %v568_v56 = vadd.f32 %v553_v54, %v439_v48 }
 0x201   : > { %573 = vst [vmem:[#allocation2 + $0x18] sm:$0xff] %v565_v51  ;;  %577 = vst [vmem:[#allocation2 + $0x38] sm:$0xff] %v569_v52 }
 0x202   : > { %572 = vst [vmem:[#allocation2 + $0x10] sm:$0xff] %v564_v55  ;;  %576 = vst [vmem:[#allocation2 + $0x30] sm:$0xff] %v568_v56 }
 0x203 PF: > { %s2898_s3 = sld [smem:[#allocation29_spill]] }
 0x209   : > { %p1108_p12 = scmp.ne.s32.totalorder %s2898_s3, 0 }
 0x20a   : > { %v602_v58 = vld [vmem:[%s2523_s17] sm:$0xff] (!%p1108_p12)  ;;  %v603_v59 = vld [vmem:[%s2523_s17 + $0x8] sm:$0xff] (!%p1108_p12)  ;;  %v604_v60 = vld [vmem:[%s2523_s17 + $0x10] sm:$0xff] (!%p1108_p12)  ;;  %1268 = vmatprep.mubr.f32.mxu0 (!%p1108_p12), %v2555_v10  ;;  %1274 = vmatprep.mubr.f32.mxu1 (!%p1108_p12), %v2558_v11 }
 0x20b   : > { %593 = sbr.rel (%p1108_p12) target bundleno = 777 (0x309), region = 68  ;;  %v1356_v61 = vpack.c.bf16 (!%p1108_p12), %v603_v59, %v602_v58  ;;  %v605_v62 = vld [vmem:[%s2523_s17 + $0x18] sm:$0xff] (!%p1108_p12)  ;;  %v606_v0 = vld [vmem:[%s2523_s17 + $0x20] sm:$0xff] (!%p1108_p12)  ;;  %v607_v1 = vld [vmem:[%s2523_s17 + $0x28] sm:$0xff] (!%p1108_p12) }
 0x20c   : > { %v1360_v63 = vpack.c.bf16 (!%p1108_p12), %v605_v62, %v604_v60  ;;  %v1364_v2 = vpack.c.bf16 (!%p1108_p12), %v607_v1, %v606_v0  ;;  %v608_v3 = vld [vmem:[%s2523_s17 + $0x30] sm:$0xff] (!%p1108_p12)  ;;  %v609_v4 = vld [vmem:[%s2523_s17 + $0x38] sm:$0xff] (!%p1108_p12)  ;;  %v610_v6 = vld [vmem:[%s2523_s17 + $0x40] sm:$0xff] (!%p1108_p12) }
 0x20d   : > { %1357 = vmatprep.subr.bf16.mxu0 (!%p1108_p12), %v1356_v61  ;;  %1436 = vmatprep.subr.bf16.mxu1 (!%p1108_p12), %v1356_v61  ;;  %v1368_v5 = vpack.c.bf16 (!%p1108_p12), %v609_v4, %v608_v3  ;;  %v611_v7 = vld [vmem:[%s2523_s17 + $0x48] sm:$0xff] (!%p1108_p12)  ;;  %v612_v9 = vld [vmem:[%s2523_s17 + $0x50] sm:$0xff] (!%p1108_p12)  ;;  %v613_v10 = vld [vmem:[%s2523_s17 + $0x58] sm:$0xff] (!%p1108_p12) }
 0x20e   : > { %1359 = vmatpush3.bf16.msra.mxu0 (!%p1108_p12), %v1356_v61  ;;  %1444 = vmatpush3.bf16.msra.mxu1 (!%p1108_p12), %v1356_v61  ;;  %v1372_v8 = vpack.c.bf16 (!%p1108_p12), %v611_v7, %v610_v6  ;;  %v1376_v11 = vpack.c.bf16 (!%p1108_p12), %v613_v10, %v612_v9  ;;  %v614_v12 = vld [vmem:[%s2523_s17 + $0x60] sm:$0xff] (!%p1108_p12)  ;;  %v615_v13 = vld [vmem:[%s2523_s17 + $0x68] sm:$0xff] (!%p1108_p12)  ;;  %v616_v15 = vld [vmem:[%s2523_s17 + $0x70] sm:$0xff] (!%p1108_p12) }
 0x20f   : > { %1361 = vmatprep.subr.bf16.mxu0 (!%p1108_p12), %v1360_v63  ;;  %1437 = vmatprep.subr.bf16.mxu1 (!%p1108_p12), %v1360_v63  ;;  %v1380_v14 = vpack.c.bf16 (!%p1108_p12), %v615_v13, %v614_v12  ;;  %v617_v16 = vld [vmem:[%s2523_s17 + $0x78] sm:$0xff] (!%p1108_p12)  ;;  %v595_v18 = vld [vmem:[#allocation3 + $0x8] sm:$0xff] (!%p1108_p12)  ;;  %v594_v20 = vld [vmem:[#allocation3] sm:$0xff] (!%p1108_p12) }
 0x210   : > { %v1384_v17 = vpack.c.bf16 (!%p1108_p12), %v617_v16, %v616_v15  ;;  %v599_v19 = vld [vmem:[#allocation3 + $0x28] sm:$0xff] (!%p1108_p12)  ;;  %v598_v21 = vld [vmem:[#allocation3 + $0x20] sm:$0xff] (!%p1108_p12)  ;;  %v597_v34 = vld [vmem:[#allocation3 + $0x18] sm:$0xff] (!%p1108_p12) }
 0x212   : > { %1363 = vmatpush3.bf16.msra.mxu0 %v1360_v63  ;;  %1445 = vmatpush3.bf16.msra.mxu1 %v1360_v63 }
 0x213   : > { %1365 = vmatprep.subr.bf16.mxu0 %v1364_v2  ;;  %1438 = vmatprep.subr.bf16.mxu1 %v1364_v2 }
 0x216   : > { %1367 = vmatpush3.bf16.msra.mxu0 %v1364_v2  ;;  %1446 = vmatpush3.bf16.msra.mxu1 %v1364_v2 }
 0x217   : > { %1369 = vmatprep.subr.bf16.mxu0 %v1368_v5  ;;  %1439 = vmatprep.subr.bf16.mxu1 %v1368_v5 }
 0x21a   : > { %1371 = vmatpush3.bf16.msra.mxu0 %v1368_v5  ;;  %1447 = vmatpush3.bf16.msra.mxu1 %v1368_v5 }
 0x21b   : > { %1373 = vmatprep.subr.bf16.mxu0 %v1372_v8  ;;  %1440 = vmatprep.subr.bf16.mxu1 %v1372_v8 }
 0x21e   : > { %1375 = vmatpush3.bf16.msra.mxu0 %v1372_v8  ;;  %1448 = vmatpush3.bf16.msra.mxu1 %v1372_v8 }
 0x21f   : > { %1377 = vmatprep.subr.bf16.mxu0 %v1376_v11  ;;  %1441 = vmatprep.subr.bf16.mxu1 %v1376_v11 }
 0x222   : > { %1379 = vmatpush3.bf16.msra.mxu0 %v1376_v11  ;;  %1449 = vmatpush3.bf16.msra.mxu1 %v1376_v11 }
 0x223   : > { %1381 = vmatprep.subr.bf16.mxu0 %v1380_v14  ;;  %1442 = vmatprep.subr.bf16.mxu1 %v1380_v14 }
 0x226   : > { %1383 = vmatpush3.bf16.msra.mxu0 %v1380_v14  ;;  %1450 = vmatpush3.bf16.msra.mxu1 %v1380_v14 }
 0x227   : > { %1385 = vmatprep.subr.bf16.mxu0 %v1384_v17  ;;  %1443 = vmatprep.subr.bf16.mxu1 %v1384_v17 }
 0x22a   : > { %1387 = vmatpush3.bf16.msra.mxu0 %v1384_v17  ;;  %1451 = vmatpush3.bf16.msra.mxu1 %v1384_v17 }
 0x22d   : > { %1269 = vmatmul.mubr.f32.vlgmr.msra.gmra.mrb[0].mxu0 %v2573_v27  ;;  %1275 = vmatmul.mubr.f32.vlgmr.msra.gmra.mrb[0].mxu1 %v2576_v28 }
 0x22e   : > { %1271 = vmatprep.mubr.f32.mxu0 %v2579_v29  ;;  %1277 = vmatprep.mubr.f32.mxu1 %v2582_v30  ;;  %v601_v29 = vld [vmem:[#allocation3 + $0x38] sm:$0xff]  ;;  %v596_v30 = vld [vmem:[#allocation3 + $0x10] sm:$0xff] }
 0x231   : > { %1272 = vmatmul.mubr.f32.gmra.mrb[2].mxu0 %v2589_v31  ;;  %1278 = vmatmul.mubr.f32.gmra.mrb[2].mxu1 %v2592_v32  ;;  %v600_v31 = vld [vmem:[#allocation3 + $0x30] sm:$0xff] }
 0x300   : > { %v1270_v22 = vpop.f32.mrb[0].mxu0  ;;  %v1276_v23 = vpop.f32.mrb[0].mxu1 }
 0x301   : > { %v724_v24 = vadd.f32 %v1270_v22, %v595_v18  ;;  %v728_v25 = vadd.f32 %v1276_v23, %v599_v19  ;;  %v684_v26 = vpop.f32.mrb[1].mxu0  ;;  %v704_v27 = vpop.f32.mrb[1].mxu1 }
 0x302   : > { %v723_v33 = vadd.f32 %v684_v26, %v594_v20  ;;  %v727_v28 = vadd.f32 %v704_v27, %v598_v21 }
 0x303   : > { %732 = vst [vmem:[#allocation3 + $0x8] sm:$0xff] %v724_v24  ;;  %736 = vst [vmem:[#allocation3 + $0x28] sm:$0xff] %v728_v25 }
 0x304   : > { %731 = vst [vmem:[#allocation3] sm:$0xff] %v723_v33  ;;  %735 = vst [vmem:[#allocation3 + $0x20] sm:$0xff] %v727_v28  ;;  %v1273_v32 = vpop.f32.mrb[2].mxu0  ;;  %v1279_v35 = vpop.f32.mrb[2].mxu1 }
 0x305   : > { %v726_v36 = vadd.f32 %v1273_v32, %v597_v34  ;;  %v730_v37 = vadd.f32 %v1279_v35, %v601_v29  ;;  %v694_v38 = vpop.f32.mrb[3].mxu0  ;;  %v714_v39 = vpop.f32.mrb[3].mxu1 }
 0x306   : > { %v725_v40 = vadd.f32 %v694_v38, %v596_v30  ;;  %v729_v41 = vadd.f32 %v714_v39, %v600_v31 }
 0x307   : > { %734 = vst [vmem:[#allocation3 + $0x18] sm:$0xff] %v726_v36  ;;  %738 = vst [vmem:[#allocation3 + $0x38] sm:$0xff] %v730_v37 }
 0x308   : > { %733 = vst [vmem:[#allocation3 + $0x10] sm:$0xff] %v725_v40  ;;  %737 = vst [vmem:[#allocation3 + $0x30] sm:$0xff] %v729_v41 }
 0x309 PF: > { %s2899_s2 = sld [smem:[#allocation28_spill]] }
 0x30f   : > { %p1109_p9 = scmp.ne.s32.totalorder %s2899_s2, 1 }
 0x310   : > { %v751_v42 = vld [vmem:[%s2530_s9] sm:$0xff] (!%p1109_p9)  ;;  %v752_v43 = vld [vmem:[%s2530_s9 + $0x8] sm:$0xff] (!%p1109_p9)  ;;  %v753_v44 = vld [vmem:[%s2530_s9 + $0x10] sm:$0xff] (!%p1109_p9) }
 0x311   : > { %742 = sbr.rel (%p1109_p9) target bundleno = 1039 (0x40f), region = 72  ;;  %v1388_v45 = vpack.c.bf16 (!%p1109_p9), %v752_v43, %v751_v42  ;;  %v754_v46 = vld [vmem:[%s2530_s9 + $0x18] sm:$0xff] (!%p1109_p9)  ;;  %v755_v48 = vld [vmem:[%s2530_s9 + $0x20] sm:$0xff] (!%p1109_p9)  ;;  %v756_v49 = vld [vmem:[%s2530_s9 + $0x28] sm:$0xff] (!%p1109_p9) }
 0x312   : > { %v1392_v47 = vpack.c.bf16 (!%p1109_p9), %v754_v46, %v753_v44  ;;  %v1396_v50 = vpack.c.bf16 (!%p1109_p9), %v756_v49, %v755_v48  ;;  %v743_v51 = vld [vmem:[#allocation3] sm:$0xff] (!%p1109_p9)  ;;  %v757_v53 = vld [vmem:[%s2530_s9 + $0x30] sm:$0xff] (!%p1109_p9)  ;;  %v758_v54 = vld [vmem:[%s2530_s9 + $0x38] sm:$0xff] (!%p1109_p9) }
 0x313   : > { %1389 = vmatprep.subr.bf16.mxu0 (!%p1109_p9), %v1388_v45  ;;  %1452 = vmatprep.subr.bf16.mxu1 (!%p1109_p9), %v1388_v45  ;;  %v747_v52 = vld [vmem:[#allocation3 + $0x20] sm:$0xff] (!%p1109_p9)  ;;  %v1400_v55 = vpack.c.bf16 (!%p1109_p9), %v758_v54, %v757_v53  ;;  %v760_v57 = vld [vmem:[%s2530_s9 + $0x48] sm:$0xff] (!%p1109_p9)  ;;  %v761_v59 = vld [vmem:[%s2530_s9 + $0x50] sm:$0xff] (!%p1109_p9) }
 0x314   : > { %1391 = vmatpush3.bf16.msra.mxu0 (!%p1109_p9), %v1388_v45  ;;  %1460 = vmatpush3.bf16.msra.mxu1 (!%p1109_p9), %v1388_v45  ;;  %v759_v56 = vld [vmem:[%s2530_s9 + $0x40] sm:$0xff] (!%p1109_p9)  ;;  %v762_v60 = vld [vmem:[%s2530_s9 + $0x58] sm:$0xff] (!%p1109_p9)  ;;  %v764_v63 = vld [vmem:[%s2530_s9 + $0x68] sm:$0xff] (!%p1109_p9) }
 0x315   : > { %1393 = vmatprep.subr.bf16.mxu0 (!%p1109_p9), %v1392_v47  ;;  %1453 = vmatprep.subr.bf16.mxu1 (!%p1109_p9), %v1392_v47  ;;  %v1404_v58 = vpack.c.bf16 (!%p1109_p9), %v760_v57, %v759_v56  ;;  %v1408_v61 = vpack.c.bf16 (!%p1109_p9), %v762_v60, %v761_v59  ;;  %v763_v62 = vld [vmem:[%s2530_s9 + $0x60] sm:$0xff] (!%p1109_p9)  ;;  %v765_v1 = vld [vmem:[%s2530_s9 + $0x70] sm:$0xff] (!%p1109_p9)  ;;  %v766_v2 = vld [vmem:[%s2530_s9 + $0x78] sm:$0xff] (!%p1109_p9) }
 0x316   : > { %1312 = vmatprep.mubr.f32.mxu0 (!%p1109_p9), %v743_v51  ;;  %1318 = vmatprep.mubr.f32.mxu1 (!%p1109_p9), %v747_v52  ;;  %v1412_v0 = vpack.c.bf16 (!%p1109_p9), %v764_v63, %v763_v62  ;;  %v1416_v3 = vpack.c.bf16 (!%p1109_p9), %v766_v2, %v765_v1  ;;  %v744_v4 = vld [vmem:[#allocation3 + $0x8] sm:$0xff] (!%p1109_p9)  ;;  %v745_v6 = vld [vmem:[#allocation3 + $0x10] sm:$0xff] (!%p1109_p9)  ;;  %v746_v8 = vld [vmem:[#allocation3 + $0x18] sm:$0xff] (!%p1109_p9) }
 0x317   : > { %v748_v5 = vld [vmem:[#allocation3 + $0x28] sm:$0xff] (!%p1109_p9)  ;;  %v749_v7 = vld [vmem:[#allocation3 + $0x30] sm:$0xff] (!%p1109_p9)  ;;  %v750_v9 = vld [vmem:[#allocation3 + $0x38] sm:$0xff] (!%p1109_p9) }
 0x318   : > { %1395 = vmatpush3.bf16.msra.mxu0 %v1392_v47  ;;  %1461 = vmatpush3.bf16.msra.mxu1 %v1392_v47  ;;  %v873_v10 = vld [vmem:[#allocation2 + $0x8] sm:$0xff]  ;;  %v872_v12 = vld [vmem:[#allocation2] sm:$0xff]  ;;  %v875_v22 = vld [vmem:[#allocation2 + $0x18] sm:$0xff] }
 0x319   : > { %1397 = vmatprep.subr.bf16.mxu0 %v1396_v50  ;;  %1454 = vmatprep.subr.bf16.mxu1 %v1396_v50  ;;  %v877_v11 = vld [vmem:[#allocation2 + $0x28] sm:$0xff]  ;;  %v876_v13 = vld [vmem:[#allocation2 + $0x20] sm:$0xff]  ;;  %v879_v23 = vld [vmem:[#allocation2 + $0x38] sm:$0xff] }
 0x31a   : > { %v874_v24 = vld [vmem:[#allocation2 + $0x10] sm:$0xff] }
 0x31b   : > { %v878_v25 = vld [vmem:[#allocation2 + $0x30] sm:$0xff] }
 0x31c   : > { %1399 = vmatpush3.bf16.msra.mxu0 %v1396_v50  ;;  %1462 = vmatpush3.bf16.msra.mxu1 %v1396_v50 }
 0x31d   : > { %1401 = vmatprep.subr.bf16.mxu0 %v1400_v55  ;;  %1455 = vmatprep.subr.bf16.mxu1 %v1400_v55 }
 0x320   : > { %1403 = vmatpush3.bf16.msra.mxu0 %v1400_v55  ;;  %1463 = vmatpush3.bf16.msra.mxu1 %v1400_v55 }
 0x321   : > { %1405 = vmatprep.subr.bf16.mxu0 %v1404_v58  ;;  %1456 = vmatprep.subr.bf16.mxu1 %v1404_v58 }
 0x324   : > { %1407 = vmatpush3.bf16.msra.mxu0 %v1404_v58  ;;  %1464 = vmatpush3.bf16.msra.mxu1 %v1404_v58 }
 0x325   : > { %1409 = vmatprep.subr.bf16.mxu0 %v1408_v61  ;;  %1457 = vmatprep.subr.bf16.mxu1 %v1408_v61 }
 0x328   : > { %1411 = vmatpush3.bf16.msra.mxu0 %v1408_v61  ;;  %1465 = vmatpush3.bf16.msra.mxu1 %v1408_v61 }
 0x329   : > { %1413 = vmatprep.subr.bf16.mxu0 %v1412_v0  ;;  %1458 = vmatprep.subr.bf16.mxu1 %v1412_v0 }
 0x32c   : > { %1415 = vmatpush3.bf16.msra.mxu0 %v1412_v0  ;;  %1466 = vmatpush3.bf16.msra.mxu1 %v1412_v0 }
 0x32d   : > { %1417 = vmatprep.subr.bf16.mxu0 %v1416_v3  ;;  %1459 = vmatprep.subr.bf16.mxu1 %v1416_v3 }
 0x330   : > { %1419 = vmatpush3.bf16.msra.mxu0 %v1416_v3  ;;  %1467 = vmatpush3.bf16.msra.mxu1 %v1416_v3 }
 0x333   : > { %1313 = vmatmul.mubr.f32.vlgmr.msra.gmra.mrb[0].mxu0 %v744_v4  ;;  %1319 = vmatmul.mubr.f32.vlgmr.msra.gmra.mrb[0].mxu1 %v748_v5 }
 0x334   : > { %1315 = vmatprep.mubr.f32.mxu0 %v745_v6  ;;  %1321 = vmatprep.mubr.f32.mxu1 %v749_v7 }
 0x337   : > { %1316 = vmatmul.mubr.f32.gmra.mrb[2].mxu0 %v746_v8  ;;  %1322 = vmatmul.mubr.f32.gmra.mrb[2].mxu1 %v750_v9 }
 0x406   : > { %v1314_v14 = vpop.f32.mrb[0].mxu0  ;;  %v1320_v15 = vpop.f32.mrb[0].mxu1 }
 0x407   : > { %v881_v16 = vadd.f32 %v1314_v14, %v873_v10  ;;  %v885_v17 = vadd.f32 %v1320_v15, %v877_v11  ;;  %v833_v18 = vpop.f32.mrb[1].mxu0  ;;  %v853_v19 = vpop.f32.mrb[1].mxu1 }
 0x408   : > { %v880_v20 = vadd.f32 %v872_v12, %v833_v18  ;;  %v884_v21 = vadd.f32 %v876_v13, %v853_v19 }
 0x409   : > { %889 = vst [vmem:[%s2545_s28 + $0x8] sm:$0xff] %v881_v16  ;;  %893 = vst [vmem:[%s2545_s28 + $0x28] sm:$0xff] %v885_v17 }
 0x40a   : > { %888 = vst [vmem:[%s2545_s28] sm:$0xff] %v880_v20  ;;  %892 = vst [vmem:[%s2545_s28 + $0x20] sm:$0xff] %v884_v21  ;;  %v1317_v26 = vpop.f32.mrb[2].mxu0  ;;  %v1323_v27 = vpop.f32.mrb[2].mxu1 }
 0x40b   : > { %v883_v33 = vadd.f32 %v1317_v26, %v875_v22  ;;  %v887_v28 = vadd.f32 %v1323_v27, %v879_v23  ;;  %v843_v34 = vpop.f32.mrb[3].mxu0  ;;  %v863_v29 = vpop.f32.mrb[3].mxu1 }
 0x40c   : > { %v882_v30 = vadd.f32 %v874_v24, %v843_v34  ;;  %v886_v31 = vadd.f32 %v878_v25, %v863_v29 }
 0x40d   : > { %891 = vst [vmem:[%s2545_s28 + $0x18] sm:$0xff] %v883_v33  ;;  %895 = vst [vmem:[%s2545_s28 + $0x38] sm:$0xff] %v887_v28 }
 0x40e   : > { %890 = vst [vmem:[%s2545_s28 + $0x10] sm:$0xff] %v882_v30  ;;  %894 = vst [vmem:[%s2545_s28 + $0x30] sm:$0xff] %v886_v31 }
 0x40f PF: > { %s2900_s10 = sld [smem:[#allocation30_spill]]  ;;  %s2901_s5 = sld [smem:[#allocation29_spill]] }
 0x410   : > { %s2902_s17 = sld [smem:[#allocation37_spill]]  ;;  %s912_s26 = sshll.u32 %s2545_s28, 4  ;;  %s2658_s26 = int_to_ptr.vmem [resolvable:$true] %s912_s26 }
 0x411   : > { %s2903_s7 = sld [smem:[#allocation46_spill]]  ;;  %s2667_s30 = scalar_lea.sflag [#allocation6], %s396_s1 }
 0x412   : > { %s1800_s25 = scalar_lea.vmem %s2658_s26, 1024  ;;  %s2032_s8 = smov [#allocation12]  }
 0x413   : > { %p1801_p11 = scmp.ne.s32.totalorder %s2658_s26, %s1800_s25  ;;  %s1804_s28 = sshll.u32 %s2032_s8, 4  ;;  %s1805_s28 = int_to_ptr.vmem [resolvable:$false] %s1804_s28 }
 0x414   : > { %s1806_s22 = scalar_lea.vmem %s1805_s28, 2048  ;;  %p1807_p6 = scmp.lt.s32.totalorder %s2658_s26, %s1805_s28 }
 0x415   : > { %s1119_s15 = sshll.u32 %s2900_s10, 4  ;;  %p1808_p1 = scmp.lt.s32.totalorder %s1806_s22, %s1800_s25 }
 0x416   : > { %s909_s27 = sadd.s32 %s2901_s5, %s1119_s15  ;;  %p2905_p0 = scmp.ne.s32.totalorder %s2902_s17, 0 }
 0x417   : > { %s1113_s18 = sshll.u32 %s909_s27, 7  ;;  %s2904_s16 = smov %s2903_s7 }
 0x418   : > { %s2663_s21 = scalar_lea.hbm %s2903_s7, %s1113_s18  ;;  %p1802_p4 = pnand %p1801_p11, %p2905_p0 }
 0x419   : > { %p1809_p8 = por %p1808_p1, %p1807_p6 }
 0x41a   : > { %p1803_p5 = pneg %p1802_p4 }
 0x41c   : > { %p1810_p13 = pnand %p1809_p8, %p1803_p5 }
 0x41e   : > { %1813 = shalt.err (!%p1810_p13)
}
 0x41f   : > { %s1814_s1 = scalar_lea.hbm %s2663_s21, 1024  ;;  %s1818_s3 = scalar_lea.hbm %s2904_s16, 4096 }
 0x420   : > { %p1815_p10 = scmp.ne.s32.totalorder %s2663_s21, %s1814_s1  ;;  %p1819_p7 = scmp.lt.u32.totalorder %s2663_s21, %s2904_s16 }
 0x421   : > { %p1820_p12 = scmp.lt.u32.totalorder %s1818_s3, %s1814_s1  ;;  %p1822_p11 = scmp.lt.u32.totalorder %s1814_s1, %s2663_s21 }
 0x422   : > { %p1816_p2 = pnand %p1815_p10, %p2905_p0 }
 0x423   : > { %p1821_p9 = por %p1820_p12, %p1819_p7 }
 0x424   : > { %p1817_p3 = pneg %p1816_p2 }
 0x425   : > { %p1823_p4 = por %p1822_p11, %p1821_p9 }
 0x427   : > { %p1824_p5 = pnand %p1823_p4, %p1817_p3 }
 0x429   : > { %1827 = shalt.err (!%p1824_p5)
}
 0x42a   : > { %s2033_s5 = smov 128   ;;  %s2034_s15 = smov 256  }
 0x42b   : > { %s2035_s27 = smov 8  }
 0x42c   : > { %1476 = dma.vmem_to_hbm [thread:$0]  (%p2905_p0), %s2658_s26, 1024, %s2663_s21, %s2667_s30, %s2033_s5, %s2034_s15, %s2035_s27  }
 0x42d PF: > { %s2906_s18 = sld [smem:[#allocation18_spill]]  ;;  %p1496_p6 = scmp.ge.s32.totalorder %s2022_s14, 2 }
 0x42e   : > { %s2907_s9 = sld [smem:[#allocation40_spill]] }
 0x433   : > { %s927_s0 = sand.u32 1, %s2906_s18  }
 0x434   : > { %p2908_p1 = scmp.ne.s32.totalorder %s2907_s9, 0  ;;  %s928_s7 = scalar_lea.sflag [#allocation6], %s927_s0 }
 0x436   : > { %p1492_p8 = pnand %p1496_p6, %p2908_p1 }
 0x438   : > { %1933 = dma.done.wait (!%p1492_p8), %s928_s7, 1024  }
 0x439   : > { %1935 = vsyncadd (!%p1492_p8), %s928_s7, 4294966272  ;;  %s27_s14 = sadd.s32 1, %s2022_s14   ;;  %s2910_s17 = sld [smem:[#allocation39_spill]] }
 0x43a   : > { %p2696_p13 = scmp.ge.s32.totalorder %s27_s14, 10   ;;  %s2911_s21 = sld [smem:[#allocation20_spill]] }
 0x43b   : > { %s2912_s22 = sld [smem:[#allocation21_spill]]  ;;  %s2913_s24 = sld [smem:[#allocation23_spill]] }
 0x43c   : > { %s2914_s26 = sld [smem:[#allocation24_spill]]  ;;  %s2915_s30 = smov %s2386_s23 }
 0x43d   : > { %s2916_s27 = sld [smem:[#allocation25_spill]]  ;;  %s2917_s28 = sld [smem:[#allocation26_spill]] }
 0x43e   : > { %s2918_s29 = sld [smem:[#allocation35_spill]]  ;;  %s2919_s8 = sld [smem:[#allocation27_spill]] }
 0x43f   : > { %s2920_s7 = sld [smem:[#allocation38_spill]]  ;;  %s2921_s18 = smov %s1942_s19 }
 0x440   : > { %s2922_s19 = smov %s1946_s20  ;;  %s2923_s10 = sld [smem:[#allocation31_spill]] }
 0x441   : > { %s2924_s20 = smov %s2910_s17  ;;  %s2925_s1 = sld [smem:[#allocation32_spill]] }
 0x442   : > { %s2926_s3 = sld [smem:[#allocation33_spill]]  ;;  %s2927_s2 = sld [smem:[#allocation36_spill]] }
 0x443   : > { %s2928_s23 = smov %s2449_s13  ;;  %s2930_s25 = smov %s2914_s26 }
 0x444   : > { %s2931_s26 = smov %s2915_s30  ;;  %s2932_s30 = smov %s1990_s6 }
 0x445   : > { %s2933_s6 = smov %s2919_s8  ;;  %s2934_s8 = smov %s2010_s11 }
 0x446   : > { %s2935_s9 = smov %s2014_s12  ;;  %26 = sbr.rel (!%p2696_p13) target bundleno = 25 (0x19), region = 141 }
 0x447   : > { %s2936_s11 = smov %s2925_s1 }
 0x448   : > { %s2937_s12 = smov %s2926_s3  ;;  %s2938_s13 = smov %s2927_s2 }
 0x44d   :  { %933 = vsyncpa [#allocation5], 1 }
 0x44e   :  { %935 = vsyncpa [#allocation5 + $0x1], 1 }
 0x44f   :  { %936 = vsyncpa [#allocation8], 1 }
 0x450   :  { %938 = vsyncpa [#allocation8 + $0x1], 1 }
 0x451   :  { %939 = vsyncpa [#allocation11], 1 }
 0x452   :  { %941 = vsyncpa [#allocation11 + $0x1], 1 }
 0x453   :  { %942 = vsyncpa [#allocation6], 1 }
 0x454   :  { %944 = vsyncpa [#allocation6 + $0x1], 1 }

</bundles_post_ra>
